<compile_context>
chip_gen: v6e
topology: v6e:2x2x1
jax: 0.10.0
libtpu: 0.0.40
codegen_flags: <defaults>
</compile_context>

<pallas_src>
import functools

import jax
import jax.numpy as jnp
from jax.experimental import pallas as pl
from jax.experimental.pallas import tpu as pltpu


# ---------------------------------------------------------------------------
# Fused kernel: whole layer stack in one grid step over the batch axis
# ---------------------------------------------------------------------------
def _mlp_fused_kernel(*refs, n_layers_total, use_softmax, matmul_dtype):
    """refs = (x_ref, w0, b0, w1, b1, ..., wL, bL, o_ref).

    Weights arrive already cast to `matmul_dtype`; activations are cast to
    `matmul_dtype` right before each MXU dot and accumulated in f32.
    """
    x_ref = refs[0]
    o_ref = refs[-1]
    wb_refs = refs[1:-1]

    h = x_ref[...].astype(jnp.float32)
    for li in range(n_layers_total):
        w = wb_refs[2 * li][...]
        b = wb_refs[2 * li + 1][...].astype(jnp.float32)
        y = jnp.dot(h.astype(matmul_dtype), w,
                    preferred_element_type=jnp.float32)
        y = y + b                                       # (tile_m, out) + (1, out)
        if li < n_layers_total - 1:
            # torch.nn.functional.leaky_relu default negative_slope = 0.01
            y = jnp.where(y >= 0, y, jnp.float32(0.01) * y)
        h = y

    if use_softmax:
        # softmax over dim=1 (feature axis), numerically stabilized
        h = h - jnp.max(h, axis=-1, keepdims=True)
        e = jnp.exp(h)
        h = e * pl.reciprocal(jnp.sum(e, axis=-1, keepdims=True), approx=True)

    # TODO(synk): for very large batches, fold 16 output rows into one
    # 128-lane row (wrapper-side reshape) so this (tile_m, 8) store is
    # lane-dense instead of a masked partial store.
    o_ref[...] = h.astype(o_ref.dtype)


# ---------------------------------------------------------------------------
# Tiling / VMEM helpers
# ---------------------------------------------------------------------------
def _choose_tile_m(m, target=512):
    """Multiple of 8; >= 2 grid steps when the batch allows it (v7x 2 TCs)."""
    if m <= 8:
        return 8
    if m <= target:
        tile = (m + 1) // 2          # at least two grid steps
    else:
        tile = target
    return max(8, ((tile + 7) // 8) * 8)


def _vmem_limit_bytes(tile_m, layer_dims, x_itemsize, w_itemsize, out_itemsize):
    """Conservative VMEM budget for the chosen tile (double-buffered I/O)."""
    b = 2 * tile_m * layer_dims[0] * x_itemsize          # x tile, 2 buffers
    b += 2 * tile_m * layer_dims[-1] * out_itemsize      # out tile, 2 buffers
    for fin, fout in zip(layer_dims[:-1], layer_dims[1:]):
        b += 2 * (fin * fout * w_itemsize + fout * 4)    # weights + biases
    b += 2 * tile_m * max(layer_dims) * 4                # live f32 activations
    b = int(2 * b)                                       # headroom for spills
    return min(max(b, 4 * 1024 * 1024), 48 * 1024 * 1024)


# ---------------------------------------------------------------------------
# MLP module (parameters + forward)
# ---------------------------------------------------------------------------
def init_mlp_params(key, input_dim, hidden_dim, output_dim, n_layers=3,
                    dtype=jnp.float32):
    """PyTorch-style init: U(-1/sqrt(fan_in), 1/sqrt(fan_in)).

    Weights are stored transposed as (in, out) so each layer is y = x @ W + b.
    Layer stack matches nn.ModuleList: in->h, (n_layers-1) x h->h, h->out.
    """
    dims = [input_dim] + [hidden_dim] * n_layers + [output_dim]
    params = []
    for fan_in, fan_out in zip(dims[:-1], dims[1:]):
        key, kw, kb = jax.random.split(key, 3)
        bound = 1.0 / (fan_in ** 0.5)
        w = jax.random.uniform(kw, (fan_in, fan_out), dtype, -bound, bound)
        b = jax.random.uniform(kb, (1, fan_out), dtype, -bound, bound)
        params.append((w, b))
    return params


def mlp_forward(x, params, input_dim, use_softmax=False,
                matmul_dtype=jnp.bfloat16, tile_m=None):
    """Equivalent of MLP.forward: view(-1, input_dim) then the fused stack."""
    x = x.reshape(-1, input_dim)
    m = x.shape[0]
    n_total = len(params)
    output_dim = params[-1][0].shape[1]
    layer_dims = [input_dim] + [w.shape[1] for (w, _) in params]

    if tile_m is None:
        tile_m = _choose_tile_m(m)
    grid_m = pl.cdiv(m, tile_m)
    m_pad = grid_m * tile_m
    if m_pad != m:
        x = jnp.pad(x, ((0, m_pad - m), (0, 0)))   # pad rows; sliced off below

    # Weights in MXU dtype (halves weight DMA + VMEM); biases stay f32.
    flat_wb = []
    in_specs = [pl.BlockSpec((tile_m, input_dim), lambda i: (i, 0))]
    for w, b in params:
        fin, fout = w.shape
        flat_wb.append(w.astype(matmul_dtype))
        flat_wb.append(b.astype(jnp.float32))
        in_specs.append(pl.BlockSpec((fin, fout), lambda i: (0, 0)))
        in_specs.append(pl.BlockSpec((1, fout), lambda i: (0, 0)))

    kernel = functools.partial(
        _mlp_fused_kernel,
        n_layers_total=n_total,
        use_softmax=use_softmax,
        matmul_dtype=matmul_dtype,
    )

    vmem_limit = _vmem_limit_bytes(
        tile_m, layer_dims,
        x_itemsize=x.dtype.itemsize,
        w_itemsize=jnp.dtype(matmul_dtype).itemsize,
        out_itemsize=jnp.dtype(x.dtype).itemsize,
    )

    out = pl.pallas_call(
        kernel,
        out_shape=jax.ShapeDtypeStruct((m_pad, output_dim), x.dtype),
        grid_spec=pltpu.PrefetchScalarGridSpec(
            num_scalar_prefetch=0,
            grid=(grid_m,),
            in_specs=in_specs,
            out_specs=pl.BlockSpec((tile_m, output_dim), lambda i: (i, 0)),
        ),
        compiler_params=pltpu.CompilerParams(
            dimension_semantics=("parallel",),
            vmem_limit_bytes=vmem_limit,
        ),
    )(x, *flat_wb)

    return out[:m] if m_pad != m else out


# ---------------------------------------------------------------------------
# Pure-JAX reference (mirrors the kernel's bf16-MXU / f32-accumulate math)
# ---------------------------------------------------------------------------
def mlp_reference(x, params, input_dim, use_softmax=False,
                  matmul_dtype=jnp.bfloat16):
    x = x.reshape(-1, input_dim).astype(jnp.float32)
    n_total = len(params)
    for li, (w, b) in enumerate(params):
        y = jnp.dot(x.astype(matmul_dtype), w.astype(matmul_dtype),
                    preferred_element_type=jnp.float32)
        y = y + b.astype(jnp.float32)
        if li < n_total - 1:
            y = jnp.where(y >= 0, y, 0.01 * y)
        x = y
    if use_softmax:
        x = jax.nn.softmax(x, axis=1)
    return x


if __name__ == "__main__":
    input_dim, hidden_dim, output_dim, n_layers = 16, 32, 8, 3

    key = jax.random.PRNGKey(0)
    key, kx = jax.random.split(key)
    # arbitrary leading shape; forward views it as (-1, input_dim)
    x = jax.random.normal(kx, (2, 4, input_dim), dtype=jnp.float32)

    params = init_mlp_params(key, input_dim, hidden_dim, output_dim, n_layers)

    # --- default path (no softmax) ---------------------------------------
    out = jax.block_until_ready(mlp_forward(x, params, input_dim))
    ref = mlp_reference(x, params, input_dim)
    assert out.shape == (8, output_dim), out.shape
    assert jnp.allclose(out, ref, atol=1e-4, rtol=1e-4), "mismatch (plain)"

    # --- softmax path (approx reciprocal -> slightly looser tolerance) ---
    out_sm = jax.block_until_ready(
        mlp_forward(x, params, input_dim, use_softmax=True))
    ref_sm = mlp_reference(x, params, input_dim, use_softmax=True)
    assert jnp.allclose(out_sm, ref_sm, atol=2e-3, rtol=2e-3), "mismatch (softmax)"

    # --- ragged batch: exercises zero-padding + a multi-step grid --------
    key, kx2 = jax.random.split(key)
    x2 = jax.random.normal(kx2, (37, input_dim), dtype=jnp.float32)
    out2 = jax.block_until_ready(mlp_forward(x2, params, input_dim))
    ref2 = mlp_reference(x2, params, input_dim)
    assert out2.shape == (37, output_dim), out2.shape
    assert jnp.allclose(out2, ref2, atol=1e-4, rtol=1e-4), "mismatch (ragged)"

    print("KERNEL_OK")
</pallas_src>

<mosaic_0001>
module attributes {stable_mosaic.version = 11 : i64} {
  func.func @_mlp_fused_kernel(%arg0: i32, %arg1: memref<8x16xf32, #tpu.memory_space<vmem>>, %arg2: memref<16x32xbf16, #tpu.memory_space<vmem>>, %arg3: memref<1x32xf32, #tpu.memory_space<vmem>>, %arg4: memref<32x32xbf16, #tpu.memory_space<vmem>>, %arg5: memref<1x32xf32, #tpu.memory_space<vmem>>, %arg6: memref<32x32xbf16, #tpu.memory_space<vmem>>, %arg7: memref<1x32xf32, #tpu.memory_space<vmem>>, %arg8: memref<32x8xbf16, #tpu.memory_space<vmem>>, %arg9: memref<1x8xf32, #tpu.memory_space<vmem>>, %arg10: memref<8x8xf32, #tpu.memory_space<vmem>>) attributes {dimension_semantics = [#tpu.dimension_semantics<parallel>], iteration_bounds = array<i64: 1>, scalar_prefetch = 0 : i64, scratch_operands = 0 : i64, tpu.core_type = #tpu.core_type<tc>, window_params = [{transform_indices = @transform_0, window_bounds = array<i64: 8, 16>}, {pipeline_mode = #tpu.pipeline_mode<synchronous>, transform_indices = @transform_1, window_bounds = array<i64: 16, 32>}, {pipeline_mode = #tpu.pipeline_mode<synchronous>, transform_indices = @transform_2, window_bounds = array<i64: 1, 32>}, {pipeline_mode = #tpu.pipeline_mode<synchronous>, transform_indices = @transform_3, window_bounds = array<i64: 32, 32>}, {pipeline_mode = #tpu.pipeline_mode<synchronous>, transform_indices = @transform_4, window_bounds = array<i64: 1, 32>}, {pipeline_mode = #tpu.pipeline_mode<synchronous>, transform_indices = @transform_5, window_bounds = array<i64: 32, 32>}, {pipeline_mode = #tpu.pipeline_mode<synchronous>, transform_indices = @transform_6, window_bounds = array<i64: 1, 32>}, {pipeline_mode = #tpu.pipeline_mode<synchronous>, transform_indices = @transform_7, window_bounds = array<i64: 32, 8>}, {pipeline_mode = #tpu.pipeline_mode<synchronous>, transform_indices = @transform_8, window_bounds = array<i64: 1, 8>}, {transform_indices = @transform_9, window_bounds = array<i64: 8, 8>}]} {
    %c0 = arith.constant 0 : index
    %c0_0 = arith.constant 0 : index
    %0 = vector.load %arg1[%c0, %c0_0] : memref<8x16xf32, #tpu.memory_space<vmem>>, vector<8x16xf32>
    %c0_1 = arith.constant 0 : index
    %c0_2 = arith.constant 0 : index
    %1 = vector.load %arg2[%c0_1, %c0_2] : memref<16x32xbf16, #tpu.memory_space<vmem>>, vector<16x32xbf16>
    %c0_3 = arith.constant 0 : index
    %c0_4 = arith.constant 0 : index
    %2 = vector.load %arg3[%c0_3, %c0_4] : memref<1x32xf32, #tpu.memory_space<vmem>>, vector<1x32xf32>
    %3 = arith.truncf %0 : vector<8x16xf32> to vector<8x16xbf16>
    %cst = arith.constant dense<0.000000e+00> : vector<8x32xf32>
    %4 = tpu.matmul %3, %1, %cst {dimension_numbers = #tpu.dot_dimension_numbers<[1], [0], [0], [1], [0, 0, 1, 1], [], []>} : vector<8x16xbf16>, vector<16x32xbf16>, vector<8x32xf32> -> vector<8x32xf32>
    %5 = vector.broadcast %2 : vector<1x32xf32> to vector<8x32xf32>
    %6 = arith.addf %4, %5 : vector<8x32xf32>
    %cst_5 = arith.constant 0.000000e+00 : f32
    %7 = vector.broadcast %cst_5 : f32 to vector<8x32xf32>
    %8 = arith.cmpf oge, %6, %7 : vector<8x32xf32>
    %cst_6 = arith.constant 0.00999999977 : f32
    %9 = vector.broadcast %cst_6 : f32 to vector<8x32xf32>
    %10 = arith.mulf %9, %6 : vector<8x32xf32>
    %11 = arith.select %8, %6, %10 : vector<8x32xi1>, vector<8x32xf32>
    %c0_7 = arith.constant 0 : index
    %c0_8 = arith.constant 0 : index
    %12 = vector.load %arg4[%c0_7, %c0_8] : memref<32x32xbf16, #tpu.memory_space<vmem>>, vector<32x32xbf16>
    %c0_9 = arith.constant 0 : index
    %c0_10 = arith.constant 0 : index
    %13 = vector.load %arg5[%c0_9, %c0_10] : memref<1x32xf32, #tpu.memory_space<vmem>>, vector<1x32xf32>
    %14 = arith.truncf %11 : vector<8x32xf32> to vector<8x32xbf16>
    %cst_11 = arith.constant dense<0.000000e+00> : vector<8x32xf32>
    %15 = tpu.matmul %14, %12, %cst_11 {dimension_numbers = #tpu.dot_dimension_numbers<[1], [0], [0], [1], [0, 0, 1, 1], [], []>} : vector<8x32xbf16>, vector<32x32xbf16>, vector<8x32xf32> -> vector<8x32xf32>
    %16 = vector.broadcast %13 : vector<1x32xf32> to vector<8x32xf32>
    %17 = arith.addf %15, %16 : vector<8x32xf32>
    %cst_12 = arith.constant 0.000000e+00 : f32
    %18 = vector.broadcast %cst_12 : f32 to vector<8x32xf32>
    %19 = arith.cmpf oge, %17, %18 : vector<8x32xf32>
    %cst_13 = arith.constant 0.00999999977 : f32
    %20 = vector.broadcast %cst_13 : f32 to vector<8x32xf32>
    %21 = arith.mulf %20, %17 : vector<8x32xf32>
    %22 = arith.select %19, %17, %21 : vector<8x32xi1>, vector<8x32xf32>
    %c0_14 = arith.constant 0 : index
    %c0_15 = arith.constant 0 : index
    %23 = vector.load %arg6[%c0_14, %c0_15] : memref<32x32xbf16, #tpu.memory_space<vmem>>, vector<32x32xbf16>
    %c0_16 = arith.constant 0 : index
    %c0_17 = arith.constant 0 : index
    %24 = vector.load %arg7[%c0_16, %c0_17] : memref<1x32xf32, #tpu.memory_space<vmem>>, vector<1x32xf32>
    %25 = arith.truncf %22 : vector<8x32xf32> to vector<8x32xbf16>
    %cst_18 = arith.constant dense<0.000000e+00> : vector<8x32xf32>
    %26 = tpu.matmul %25, %23, %cst_18 {dimension_numbers = #tpu.dot_dimension_numbers<[1], [0], [0], [1], [0, 0, 1, 1], [], []>} : vector<8x32xbf16>, vector<32x32xbf16>, vector<8x32xf32> -> vector<8x32xf32>
    %27 = vector.broadcast %24 : vector<1x32xf32> to vector<8x32xf32>
    %28 = arith.addf %26, %27 : vector<8x32xf32>
    %cst_19 = arith.constant 0.000000e+00 : f32
    %29 = vector.broadcast %cst_19 : f32 to vector<8x32xf32>
    %30 = arith.cmpf oge, %28, %29 : vector<8x32xf32>
    %cst_20 = arith.constant 0.00999999977 : f32
    %31 = vector.broadcast %cst_20 : f32 to vector<8x32xf32>
    %32 = arith.mulf %31, %28 : vector<8x32xf32>
    %33 = arith.select %30, %28, %32 : vector<8x32xi1>, vector<8x32xf32>
    %c0_21 = arith.constant 0 : index
    %c0_22 = arith.constant 0 : index
    %34 = vector.load %arg8[%c0_21, %c0_22] : memref<32x8xbf16, #tpu.memory_space<vmem>>, vector<32x8xbf16>
    %c0_23 = arith.constant 0 : index
    %c0_24 = arith.constant 0 : index
    %35 = vector.load %arg9[%c0_23, %c0_24] : memref<1x8xf32, #tpu.memory_space<vmem>>, vector<1x8xf32>
    %36 = arith.truncf %33 : vector<8x32xf32> to vector<8x32xbf16>
    %cst_25 = arith.constant dense<0.000000e+00> : vector<8x8xf32>
    %37 = tpu.matmul %36, %34, %cst_25 {dimension_numbers = #tpu.dot_dimension_numbers<[1], [0], [0], [1], [0, 0, 1, 1], [], []>} : vector<8x32xbf16>, vector<32x8xbf16>, vector<8x8xf32> -> vector<8x8xf32>
    %38 = vector.broadcast %35 : vector<1x8xf32> to vector<8x8xf32>
    %39 = arith.addf %37, %38 : vector<8x8xf32>
    %c0_26 = arith.constant 0 : index
    %c0_27 = arith.constant 0 : index
    %40 = vector.load %arg10[%c0_26, %c0_27] : memref<8x8xf32, #tpu.memory_space<vmem>>, vector<8x8xf32>
    tpu.vector_store %arg10[%c0_26, %c0_27], %39 {strides = array<i32>} : memref<8x8xf32, #tpu.memory_space<vmem>>, vector<8x8xf32>,
    return
  }
  func.func @transform_0(%arg0: i32) -> (i32, i32) {
    %c0_i32 = arith.constant 0 : i32
    %c0_i32_0 = arith.constant 0 : i32
    return %arg0, %c0_i32 : i32, i32
  }
  func.func @transform_1(%arg0: i32) -> (i32, i32) {
    %c0_i32 = arith.constant 0 : i32
    %c0_i32_0 = arith.constant 0 : i32
    %c0_i32_1 = arith.constant 0 : i32
    return %c0_i32, %c0_i32_0 : i32, i32
  }
  func.func @transform_2(%arg0: i32) -> (i32, i32) {
    %c0_i32 = arith.constant 0 : i32
    %c0_i32_0 = arith.constant 0 : i32
    %c0_i32_1 = arith.constant 0 : i32
    return %c0_i32, %c0_i32_0 : i32, i32
  }
  func.func @transform_3(%arg0: i32) -> (i32, i32) {
    %c0_i32 = arith.constant 0 : i32
    %c0_i32_0 = arith.constant 0 : i32
    %c0_i32_1 = arith.constant 0 : i32
    return %c0_i32, %c0_i32_0 : i32, i32
  }
  func.func @transform_4(%arg0: i32) -> (i32, i32) {
    %c0_i32 = arith.constant 0 : i32
    %c0_i32_0 = arith.constant 0 : i32
    %c0_i32_1 = arith.constant 0 : i32
    return %c0_i32, %c0_i32_0 : i32, i32
  }
  func.func @transform_5(%arg0: i32) -> (i32, i32) {
    %c0_i32 = arith.constant 0 : i32
    %c0_i32_0 = arith.constant 0 : i32
    %c0_i32_1 = arith.constant 0 : i32
    return %c0_i32, %c0_i32_0 : i32, i32
  }
  func.func @transform_6(%arg0: i32) -> (i32, i32) {
    %c0_i32 = arith.constant 0 : i32
    %c0_i32_0 = arith.constant 0 : i32
    %c0_i32_1 = arith.constant 0 : i32
    return %c0_i32, %c0_i32_0 : i32, i32
  }
  func.func @transform_7(%arg0: i32) -> (i32, i32) {
    %c0_i32 = arith.constant 0 : i32
    %c0_i32_0 = arith.constant 0 : i32
    %c0_i32_1 = arith.constant 0 : i32
    return %c0_i32, %c0_i32_0 : i32, i32
  }
  func.func @transform_8(%arg0: i32) -> (i32, i32) {
    %c0_i32 = arith.constant 0 : i32
    %c0_i32_0 = arith.constant 0 : i32
    %c0_i32_1 = arith.constant 0 : i32
    return %c0_i32, %c0_i32_0 : i32, i32
  }
  func.func @transform_9(%arg0: i32) -> (i32, i32) {
    %c0_i32 = arith.constant 0 : i32
    %c0_i32_0 = arith.constant 0 : i32
    return %arg0, %c0_i32 : i32, i32
  }
}

</mosaic_0001>

<bundles_post_ra>
// kernel: tpu_custom_call.1
= control target key start
LH: loop header
LB: loop body
LE: loop exit
PB: predicated region body
PF: predicated region fallthrough
CT: control target
= control target key end

     0   :  { %14 = vsyncpa [#allocation3], 0  ;;  %s621_s0 = inlined_call_operand.vmem [shape: f32[8,16], index: 0, kind: input, shape index: {}]   ;;  %s622_s1 = inlined_call_operand.hbm [shape: bf16[16,32], index: 1, kind: input, shape index: {}]   ;;  %s623_s2 = inlined_call_operand.vmem [shape: f32[1,32], index: 2, kind: input, shape index: {}]   ;;  %s624_s3 = inlined_call_operand.vmem [shape: bf16[32,32], index: 3, kind: input, shape index: {}]   ;;  %s625_s4 = inlined_call_operand.hbm [shape: f32[1,32], index: 4, kind: input, shape index: {}]   ;;  %s626_s5 = inlined_call_operand.hbm [shape: bf16[32,32], index: 5, kind: input, shape index: {}]   ;;  %s627_s6 = inlined_call_operand.vmem [shape: f32[1,32], index: 6, kind: input, shape index: {}]   ;;  %s628_s7 = inlined_call_operand.vmem [shape: bf16[32,8], index: 7, kind: input, shape index: {}]   ;;  %s629_s8 = inlined_call_operand.vmem [shape: f32[1,8], index: 8, kind: input, shape index: {}]   ;;  %s630_s9 = inlined_call_operand.hbm [shape: f32[8,8], index: 9, kind: output, shape index: {}]  }
   0x1   :  { %15 = vsyncpa [#allocation6], 0 }
   0x2   :  { %16 = vsyncpa [#allocation4], 0  ;;  %s520_s30 = smov [#allocation5]   ;;  %s521_s11 = smov [#allocation2]  }
   0x3   :  { %s41_s10 = sshll.u32 %s520_s30, 4  ;;  %s24_s12 = sshll.u32 %s521_s11, 4  ;;  %s42_s10 = int_to_ptr.vmem [resolvable:$true] %s41_s10  ;;  %s25_s12 = int_to_ptr.vmem [resolvable:$true] %s24_s12 }
   0x4   :  { %s442_s13 = scalar_lea.vmem %s42_s10, 16  ;;  %s446_s14 = scalar_lea.vmem %s42_s10, 32 }
   0x5   :  { %p443_p0 = scmp.ne.s32.totalorder %s42_s10, %s442_s13  ;;  %p447_p1 = scmp.lt.s32.totalorder %s42_s10, %s42_s10 }
   0x6   :  { %p448_p2 = scmp.lt.s32.totalorder %s446_s14, %s442_s13 }
   0x8   :  { %p449_p3 = por %p448_p2, %p447_p1 }
   0xa   :  { %p450_p4 = pnand %p449_p3, %p443_p0 }
   0xc   :  { %453 = shalt.err (!%p450_p4)
}
   0xd   :  { %44 = dma.hbm_to_vmem [thread:$0]  %s625_s4, 16, %s42_s10, [#allocation6]  }
   0xe   :  { %s462_s17 = scalar_lea.vmem %s25_s12, 128  ;;  %p467_p6 = scmp.lt.s32.totalorder %s25_s12, %s25_s12 }
   0xf   :  { %p463_p5 = scmp.ne.s32.totalorder %s25_s12, %s462_s17  ;;  %p468_p7 = scmp.lt.s32.totalorder %s462_s17, %s462_s17 }
  0x11   :  { %p469_p8 = por %p468_p7, %p467_p6 }
  0x13   :  { %p470_p9 = pnand %p469_p8, %p463_p5 }
  0x15   :  { %473 = shalt.err (!%p470_p9)
}
  0x16   :  { %s522_s18 = smov 64   ;;  %s523_s19 = smov 4  }
  0x17   :  { %30 = dma.hbm_to_vmem [thread:$0]  %s622_s1, 128, %s25_s12, [#allocation3], %s522_s18, %s522_s18, %s523_s19  }
  0x18   :  { %s524_s22 = smov [#allocation7]  }
  0x19   :  { %s50_s23 = sshll.u32 %s524_s22, 4  ;;  %s51_s23 = int_to_ptr.vmem [resolvable:$true] %s50_s23 }
  0x1a   :  { %s482_s24 = scalar_lea.vmem %s51_s23, 256  ;;  %p487_p11 = scmp.lt.s32.totalorder %s51_s23, %s51_s23 }
  0x1b   :  { %p483_p10 = scmp.ne.s32.totalorder %s51_s23, %s482_s24  ;;  %p488_p12 = scmp.lt.s32.totalorder %s482_s24, %s482_s24 }
  0x1d   :  { %p489_p13 = por %p488_p12, %p487_p11 }
  0x1f   :  { %p490_p0 = pnand %p489_p13, %p483_p10 }
  0x21   :  { %493 = shalt.err (!%p490_p0)
}
  0x22   :  { %56 = dma.hbm_to_vmem [thread:$0]  %s626_s5, 256, %s51_s23, [#allocation6], %s522_s18, %s522_s18, %s523_s19  }
  0x23   :  { %514 = dma.done.wait [#allocation3], 128  }
  0x24   :  { %515 = vsyncadd [#allocation3], 4294967168 }
  0x25   :  { %516 = dma.done.wait [#allocation6], 272  }
  0x26   :  { %517 = vsyncadd [#allocation6], 4294967024  ;;  %v525_v0 = vmov 0.0   ;;  %vm526_vm0 = vmmov 0   ;;  %v427_v1 = vld [vmem:[#allocation2] sm:$0xff]   ;;  %vm90_vm1 = vcmask 130048  }
  0x27   :  { %389 = vmatprep.subr.bf16.mxu0 %v525_v0  ;;  %391 = vmatprep.mubr.msk.bf16.mxu0 %vm526_vm0, %v525_v0  ;;  %v73_v2 = vld [vmem:[%s621_s0] sm:$0xff]  ;;  %v428_v4 = vld [vmem:[%s624_s3 + $0x8] sm:$0xff]   ;;  %vm161_vm3 = vcmask 261120   ;;  %v430_v15 = vld [vmem:[#allocation7 + $0x8] sm:$0xff]   ;;  %vm345_vm6 = vcmask 64512  }
  0x28   :  { %395 = vmatprep.subr.bf16.mxu1 %v525_v0  ;;  %399 = vmatprep.mubr.msk.bf16.mxu1 %vm526_vm0, %v525_v0  ;;  %v77_v3 = vpack.c.bf16 %v73_v2, %v73_v2  ;;  %v429_v5 = vld [vmem:[%s624_s3] sm:$0xff]   ;;  %v431_v16 = vld [vmem:[#allocation7] sm:$0xff]   ;;  %v366_v17 = vld [vmem:[#allocation5] ss:$0 sm:$0xff] }
  0x29   :  { %390 = vmatpush3.bf16.msra.mxu0 %v427_v1  ;;  %396 = vmatpush3.bf16.msra.mxu1 %v428_v4  ;;  %v363_v6 = vld [vmem:[%s623_s2] ss:$0 sm:$0xff]  ;;  %v432_v26 = vld [vmem:[%s628_s7 + $0x8] sm:$0xff]  }
  0x2a   :  { %403 = vmatprep.subr.bf16.mxu0 %v525_v0  ;;  %397 = vmatprep.subr.bf16.mxu1 %v525_v0  ;;  %v433_v27 = vld [vmem:[%s628_s7] sm:$0xff]   ;;  %s527_s7 = smov [#allocation8]  }
  0x2b   :  { %v370_v28 = vld [vmem:[%s627_s6] ss:$0 sm:$0xff]  ;;  %s353_s16 = sshll.u32 %s527_s7, 4  ;;  %s354_s16 = int_to_ptr.vmem [resolvable:$true] %s353_s16 }
  0x2c   :  { %392 = vmatmul.mubr.msk.bf16.vlgmr.msra.gmra.mxu0 %vm90_vm1, %v77_v3  ;;  %v374_v37 = vld [vmem:[%s629_s8] ss:$0 sm:$0xff]  ;;  %s494_s6 = scalar_lea.vmem %s354_s16, 128  ;;  %p499_p2 = scmp.lt.s32.totalorder %s354_s16, %s354_s16 }
  0x2d   :  { %407 = vmatprep.mubr.msk.bf16.mxu0 %vm526_vm0, %v525_v0  ;;  %398 = vmatpush3.bf16.msra.mxu1 %v429_v5  ;;  %p495_p1 = scmp.ne.s32.totalorder %s354_s16, %s494_s6  ;;  %p500_p3 = scmp.lt.s32.totalorder %s494_s6, %s494_s6 }
  0x2e   :  { %411 = vmatprep.subr.bf16.mxu1 %v525_v0  ;;  %404 = vmatpush3.bf16.msra.mxu0 %v430_v15 }
  0x2f   :  { %405 = vmatprep.subr.bf16.mxu0 %v525_v0  ;;  %p501_p4 = por %p500_p3, %p499_p2 }
  0x31   :  { %p502_p5 = pnand %p501_p4, %p495_p1 }
  0x32   :  { %406 = vmatpush3.bf16.msra.mxu0 %v431_v16 }
  0xec   :  { %v128_v7 = vpop.f32.mrf.mxu0 }
  0xed   :  { %v129_v8 = vadd.f32 %v363_v6, %v128_v7 }
  0xee   :  { %v393_v9 = vpop.f32.mrf.mxu0 }
  0xef   :  { %vm134_vm2 = vcmp.ge.f32.partialorder %v129_v8, 0.0  ;;  %v135_v10 = vmul.f32 0.01, %v129_v8 }
  0xf0   :  { %v131_v11 = vpop.f32.mrf.mxu0 }
  0xf1   :  { %v136_v12 = vsel %vm134_vm2, %v129_v8, %v135_v10 }
  0xf2   :  { %v142_v13 = vpack.c.bf16 %v136_v12, %v136_v12  ;;  %v394_v14 = vpop.f32.mrf.mxu0 }
  0xf4   :  { %400 = vmatmul.mubr.msk.bf16.vlgmr.msra.gmra.mxu1 %vm161_vm3, %v142_v13 }
  0xf5   :  { %415 = vmatprep.mubr.msk.bf16.mxu1 %vm526_vm0, %v525_v0  ;;  %412 = vmatpush3.bf16.msra.mxu1 %v432_v26 }
  0xf6   :  { %413 = vmatprep.subr.bf16.mxu1 %v525_v0 }
  0xf9   :  { %414 = vmatpush3.bf16.msra.mxu1 %v433_v27 }
 0x1b4   :  { %v199_v18 = vpop.f32.mrf.mxu1 }
 0x1b5   :  { %v200_v19 = vadd.f32 %v366_v17, %v199_v18 }
 0x1b6   :  { %v401_v20 = vpop.f32.mrf.mxu1 }
 0x1b7   :  { %vm205_vm4 = vcmp.ge.f32.partialorder %v200_v19, 0.0  ;;  %v206_v21 = vmul.f32 0.01, %v200_v19 }
 0x1b8   :  { %v202_v22 = vpop.f32.mrf.mxu1 }
 0x1b9   :  { %v207_v23 = vsel %vm205_vm4, %v200_v19, %v206_v21 }
 0x1ba   :  { %v213_v24 = vpack.c.bf16 %v207_v23, %v207_v23  ;;  %v402_v25 = vpop.f32.mrf.mxu1 }
 0x1bc   :  { %408 = vmatmul.mubr.msk.bf16.vlgmr.msra.gmra.mxu0 %vm161_vm3, %v213_v24 }
 0x27c   :  { %v269_v29 = vpop.f32.mrf.mxu0 }
 0x27d   :  { %v270_v30 = vadd.f32 %v370_v28, %v269_v29 }
 0x27e   :  { %v409_v31 = vpop.f32.mrf.mxu0 }
 0x27f   :  { %vm275_vm5 = vcmp.ge.f32.partialorder %v270_v30, 0.0  ;;  %v276_v32 = vmul.f32 0.01, %v270_v30 }
 0x280   :  { %v272_v33 = vpop.f32.mrf.mxu0 }
 0x281   :  { %v277_v34 = vsel %vm275_vm5, %v270_v30, %v276_v32 }
 0x282   :  { %v283_v35 = vpack.c.bf16 %v277_v34, %v277_v34  ;;  %v410_v36 = vpop.f32.mrf.mxu0 }
 0x284   :  { %416 = vmatmul.mubr.msk.bf16.vlgmr.msra.gmra.mxu1 %vm161_vm3, %v283_v35 }
 0x344   :  { %v339_v38 = vpop.f32.mrf.mxu1 }
 0x345   :  { %v340_v39 = vadd.f32 %v374_v37, %v339_v38 }
 0x346   :  { %v417_v40 = vpop.f32.mrf.mxu1 }
 0x347   :  { %346 = vst.msk [vmem:[#allocation8] sm:$0xff] %vm345_vm6, %v340_v39 }
 0x348   :  { %v342_v41 = vpop.f32.mrf.mxu1 }
 0x349   :  { %505 = shalt.err (!%p502_p5)
}
 0x34a   :  { %356 = dma.vmem_to_hbm [thread:$0]  %s354_s16, 128, %s630_s9, [#allocation4]   ;;  %v418_v42 = vpop.f32.mrf.mxu1 }
 0x34b   :  { %518 = dma.done.wait [#allocation4], 128  }
 0x34c   :  { %519 = vsyncadd [#allocation4], 4294967168 }
 0x34d   :  { %360 = vsyncpa [#allocation3], 1 }
 0x34e   :  { %361 = vsyncpa [#allocation6], 1 }
 0x34f   :  { %362 = vsyncpa [#allocation4], 1 }

</bundles_post_ra>
